<compile_context>
chip_gen: v7x
topology: tpu7x:2x2x1
jax: 0.10.0
libtpu: 0.0.40
codegen_flags: <defaults>
</compile_context>

<pallas_src>
import functools

import jax
import jax.numpy as jnp
from jax.experimental import pallas as pl
from jax.experimental.pallas import tpu as pltpu

# ----------------------------- sizes -----------------------------------------
B = 8      # demo batch
D = 32     # obs_flat feature dim
H = 32     # base network hidden size (hidden_layer_size)
E = 32     # enn_layer
Z = 8      # z_dim
O = 1      # base network output dim (scalar value head); kernel supports O == 1
assert O == 1, "fused kernel epilogue assumes a scalar base head (O == 1)"

LEAKY_SLOPE = 0.01          # nn.LeakyReLU default
PW = E + O + 1              # packed slab width = 34  ([lwh | wl | pv] columns)

# packed-parameter slab row offsets (sublane-aligned where it matters)
_R_W1 = 0                   # w1        (D, H)
_R_W2 = 32                  # w2        (H, H)
_R_LW2 = 64                 # lw2       (E, E)
_R_WC = 96                  # [lwh|wl|pv]  (H, PW)
_R_B1 = 128                 # b1        (1, H)
_R_B2 = 129                 # b2        (1, H)
_R_BC = 130                 # [lb1|bl|cb]  (1, PW)
_R_LWZ = 131                # lwz row   (1, E)
_R_LB2 = 132                # lb2       (1, E)
_R_LW3 = 133                # lw3^T     (1, E)
_ROWS = 136                 # padded to a multiple of 8

# v7x-safe per-tile batch cap: Z-replicated intermediates (lh_rep/a1/a2) are
# ~3 KiB per batch row; 512 rows ~ 1.5 MiB live + double-buffered obs/z/out,
# comfortably inside the 32 MiB scoped-VMEM default on v7x (64 MiB physical).
# v5e/v6e (128 MiB VMEM) tolerate 2-4x larger tiles if ever needed.
VMEM_SAFE_BB = 512


def _lrelu(x):
    return jnp.where(x >= 0, x, LEAKY_SLOPE * x)


# ----------------------------- kernel -----------------------------------------
def enn_wrapper_kernel(obs_ref, z_ref, p_ref, s_ref, out_ref):
    obs = obs_ref[...]                     # (bb, D)
    z = z_ref[...]                         # (bb, Z)
    bb = obs.shape[0]

    # static slices of the packed parameter slab (sublane-aligned views)
    w1 = p_ref[_R_W1:_R_W1 + D, 0:H]
    w2 = p_ref[_R_W2:_R_W2 + H, 0:H]
    lw2 = p_ref[_R_LW2:_R_LW2 + E, 0:E]
    wc = p_ref[_R_WC:_R_WC + H, :]         # (H, E+O+1) = [lwh | wl | pv]
    b1 = p_ref[_R_B1:_R_B1 + 1, 0:H]
    b2 = p_ref[_R_B2:_R_B2 + 1, 0:H]
    bc = p_ref[_R_BC:_R_BC + 1, :]         # (1, E+O+1) = [lb1 | bl | cb]
    lwz = p_ref[_R_LWZ:_R_LWZ + 1, 0:E]
    lb2 = p_ref[_R_LB2:_R_LB2 + 1, 0:E]
    lw3 = p_ref[_R_LW3:_R_LW3 + 1, 0:E]

    # scalar constants from SMEM: free sreg reads, no cross-lane extract
    lb3 = s_ref[0]
    cz = s_ref[1]

    # --- base network (torch.no_grad in reference; pure fwd here) ------------
    h1 = _lrelu(jnp.dot(obs, w1, preferred_element_type=jnp.float32) + b1)
    inter = _lrelu(jnp.dot(h1, w2, preferred_element_type=jnp.float32) + b2)

    # fused matmul: [ l_h | base_pre | prior_h ] = inter @ [lwh | wl | pv] + bc
    comb = jnp.dot(inter, wc, preferred_element_type=jnp.float32) + bc
    l_h = comb[:, 0:E]                     # (bb, E)  learnable layer-1 hidden
    base = _lrelu(comb[:, E:E + O])        # (bb, O)  base head (O == 1)
    ph = comb[:, E + O:E + O + 1]          # (bb, 1)  inter @ pv + cb

    # --- learnable head, batched over Z (rows ordered z-major: r = zi*bb + b) -
    lh_rep = jnp.concatenate([l_h] * Z, axis=0)                           # (Z*bb, E)
    # direct z replication (review item): row r = zi*bb + b picks z[b, zi]
    zcol = jnp.concatenate([z[:, zi:zi + 1] for zi in range(Z)], axis=0)  # (Z*bb, 1)

    a1 = _lrelu(lh_rep + zcol * lwz)                                      # (Z*bb, E)
    a2 = _lrelu(jnp.dot(a1, lw2, preferred_element_type=jnp.float32) + lb2)
    a3 = _lrelu(jnp.sum(a2 * lw3, axis=-1, keepdims=True) + lb3)          # (Z*bb, 1)
    wsum = a3 * zcol                                                      # (Z*bb, 1)

    # bmm(out^T, z): balanced pairwise-add tree over the Z slabs (3 levels)
    parts = [wsum[zi * bb:(zi + 1) * bb, :] for zi in range(Z)]
    while len(parts) > 1:
        parts = [parts[i] + parts[i + 1] for i in range(0, len(parts), 2)]
    learnable = parts[0]                                                  # (bb, 1)

    # --- prior head, collapsed analytically (it is affine in z) --------------
    s1 = jnp.sum(z, axis=-1, keepdims=True)            # sum_z z
    s2 = jnp.sum(z * z, axis=-1, keepdims=True)        # sum_z z^2
    prior = cz * s2 + s1 * ph                          # (bb, 1)

    enn = learnable + prior
    # forward(): out_dim == 1  ->  base_output + enn_out  (fused epilogue)
    # TODO(synk): for bb >= 128 a lane-dense (2, bsz) transposed output layout
    # would make the store path unmasked vst; kept (bb, 2) here (negligible at
    # these tile sizes, per review).
    out_ref[...] = jnp.concatenate([base + enn, enn], axis=-1)            # (bb, 2)


# ----------------------------- wrapper ----------------------------------------
def prepare_params(params):
    """One-time host-side packing: collapse the linear prior head and pack all
    parameters into a single (136, 34) f32 slab plus a (2,) SMEM scalar vector."""
    (w1, b1, w2, b2, wl, bl,
     lwz, lwh, lb1, lw2, lb2, lw3, lb3,
     pwz, pwh, pb1, pw2, pb2, pw3, pb3) = params

    # prior_layers are Linear-only => collapse:
    #   sum_z z * p3_z = cz * sum z^2 + (x @ pv + cb) * sum z
    pv = pwh @ pw2 @ pw3                                 # (H, 1)
    cz = pwz @ pw2 @ pw3                                 # (1, 1)
    cb = pb1 @ pw2 @ pw3 + pb2 @ pw3 + pb3               # (1, 1)

    wc = jnp.concatenate([lwh, wl, pv], axis=1)          # (H, PW)
    bc = jnp.concatenate([lb1, bl, cb], axis=1)          # (1, PW)

    def pad(a):
        return jnp.pad(a, ((0, 0), (0, PW - a.shape[1])))

    slab = jnp.concatenate([
        pad(w1),                                         # rows   0: 32
        pad(w2),                                         # rows  32: 64
        pad(lw2),                                        # rows  64: 96
        wc,                                              # rows  96:128
        pad(b1), pad(b2), bc, pad(lwz), pad(lb2),        # rows 128:133
        pad(lw3.T),                                      # row  133
        jnp.zeros((_ROWS - 134, PW), jnp.float32),       # rows 134:136 (pad)
    ], axis=0)
    assert slab.shape == (_ROWS, PW)

    # scalars that would otherwise need single-lane extracts -> SMEM
    scalars = jnp.concatenate([lb3.reshape(1), cz.reshape(1)]).astype(jnp.float32)
    return slab, scalars


@functools.partial(jax.jit, static_argnames=("bb",))
def enn_wrapper_forward(obs, z, slab, scalars, bb=None):
    """pass_through_layers + forward() branch (O==1 -> base_output + enn_out).

    Batch is tiled with pl.cdiv + zero-padding (no rows silently dropped); the
    parameter slab DMA and kernel launch are paid once for the whole grid.
    """
    bsz = obs.shape[0]
    if bb is None:
        bb = bsz if bsz <= VMEM_SAFE_BB else VMEM_SAFE_BB
    grid_n = pl.cdiv(bsz, bb)
    padded = grid_n * bb
    if padded != bsz:
        obs = jnp.pad(obs, ((0, padded - bsz), (0, 0)))
        z = jnp.pad(z, ((0, padded - bsz), (0, 0)))

    out = pl.pallas_call(
        enn_wrapper_kernel,
        grid=(grid_n,),
        in_specs=[
            pl.BlockSpec((bb, D), lambda i: (i, 0)),            # obs tile
            pl.BlockSpec((bb, Z), lambda i: (i, 0)),            # z tile
            pl.BlockSpec((_ROWS, PW), lambda i: (0, 0)),        # packed params (constant index)
            pl.BlockSpec(memory_space=pltpu.MemorySpace.SMEM),  # scalars (lb3, cz)
        ],
        out_specs=pl.BlockSpec((bb, 2), lambda i: (i, 0)),
        out_shape=jax.ShapeDtypeStruct((padded, 2), jnp.float32),
        compiler_params=pltpu.CompilerParams(
            dimension_semantics=("parallel",)),
    )(obs, z, slab, scalars)

    out = out[:bsz]
    return out[:, 0:1], out[:, 1:2]


# ----------------------------- param init -------------------------------------
def xavier_normal(key, fan_in, fan_out):
    std = (2.0 / (fan_in + fan_out)) ** 0.5
    return std * jax.random.normal(key, (fan_in, fan_out), jnp.float32)


def init_params(key):
    ks = jax.random.split(key, 10)
    # base network: Linear(D,H)+LeakyReLU, Linear(H,H)+LeakyReLU ; last layer Linear(H,O)+LeakyReLU
    w1 = xavier_normal(ks[0], D, H); b1 = jnp.zeros((1, H), jnp.float32)
    w2 = xavier_normal(ks[1], H, H); b2 = jnp.zeros((1, H), jnp.float32)
    wl = xavier_normal(ks[2], H, O); bl = jnp.zeros((1, O), jnp.float32)
    # learnable_layers: SlimFC(H+1,E,LeakyReLU), SlimFC(E,E,LeakyReLU), SlimFC(E,1,LeakyReLU)
    lw1 = xavier_normal(ks[3], H + 1, E)
    lwz, lwh = lw1[0:1, :], lw1[1:, :]
    lb1 = jnp.zeros((1, E), jnp.float32)
    lw2 = xavier_normal(ks[4], E, E); lb2 = jnp.zeros((1, E), jnp.float32)
    lw3 = xavier_normal(ks[5], E, 1); lb3 = jnp.zeros((1, 1), jnp.float32)
    # prior_layers: SlimFC(H+1,E), SlimFC(E,E), SlimFC(E,1)  (no activation)
    pw1 = xavier_normal(ks[6], H + 1, E)
    pwz, pwh = pw1[0:1, :], pw1[1:, :]
    pb1 = jnp.zeros((1, E), jnp.float32)
    pw2 = xavier_normal(ks[7], E, E); pb2 = jnp.zeros((1, E), jnp.float32)
    pw3 = xavier_normal(ks[8], E, 1); pb3 = jnp.zeros((1, 1), jnp.float32)
    return (w1, b1, w2, b2, wl, bl,
            lwz, lwh, lb1, lw2, lb2, lw3, lb3,
            pwz, pwh, pb1, pw2, pb2, pw3, pb3)


# ----------------------------- pure-JAX reference ------------------------------
def reference_forward(obs, z, params):
    (w1, b1, w2, b2, wl, bl,
     lwz, lwh, lb1, lw2, lb2, lw3, lb3,
     pwz, pwh, pb1, pw2, pb2, pw3, pb3) = params
    bsz = obs.shape[0]
    h1 = _lrelu(obs @ w1 + b1)
    inter = _lrelu(h1 @ w2 + b2)
    base = _lrelu(inter @ wl + bl)
    # enn_input = cat(z.unsqueeze(-1), inter.unsqueeze(1).expand(-1,Z,-1)), dim=2
    enn_in = jnp.concatenate(
        [z[:, :, None], jnp.broadcast_to(inter[:, None, :], (bsz, Z, H))], axis=2)
    lw1_full = jnp.concatenate([lwz, lwh], axis=0)
    pw1_full = jnp.concatenate([pwz, pwh], axis=0)
    a = _lrelu(jnp.einsum("bzi,io->bzo", enn_in, lw1_full) + lb1)
    a = _lrelu(jnp.einsum("bzi,io->bzo", a, lw2) + lb2)
    a = _lrelu(jnp.einsum("bzi,io->bzo", a, lw3) + lb3)            # (bsz, Z, 1)
    p = jnp.einsum("bzi,io->bzo", enn_in, pw1_full) + pb1
    p = jnp.einsum("bzi,io->bzo", p, pw2) + pb2
    p = jnp.einsum("bzi,io->bzo", p, pw3) + pb3                    # (bsz, Z, 1)
    learnable = jnp.sum(a[..., 0] * z, axis=1, keepdims=True)      # bmm(out^T, z)
    prior = jnp.sum(p[..., 0] * z, axis=1, keepdims=True)
    enn_out = learnable + prior
    return base + enn_out, enn_out                                  # O == 1 branch


# ----------------------------- main -------------------------------------------
if __name__ == "__main__":
    key = jax.random.PRNGKey(0)
    k_obs, k_z, k_par, k_obs2, k_z2 = jax.random.split(key, 5)

    params = init_params(k_par)
    slab, scalars = prepare_params(params)   # one-time packing (prior head collapsed)

    # --- module-native small case: B=8, single tile, grid=(1,) ---------------
    obs = jax.random.normal(k_obs, (B, D), jnp.float32)   # input_dict['obs_flat']
    # self.distribution.sample((B,)) with Normal(mean=0, std=1) over z_dim
    z = jax.random.normal(k_z, (B, Z), jnp.float32)

    out, enn_out = enn_wrapper_forward(obs, z, slab, scalars)
    jax.block_until_ready(out)

    ref_out, ref_enn = reference_forward(obs, z, params)
    assert out.shape == (B, 1)
    assert jnp.allclose(out, ref_out, atol=1e-4, rtol=1e-4), "mismatch vs reference"
    assert jnp.allclose(enn_out, ref_enn, atol=1e-4, rtol=1e-4), "enn mismatch"

    # --- amortized multi-tile path: 200 rows, bb=128 -> pad to 256, grid=(2,) -
    B2 = 200
    obs2 = jax.random.normal(k_obs2, (B2, D), jnp.float32)
    z2 = jax.random.normal(k_z2, (B2, Z), jnp.float32)

    out2, enn2 = enn_wrapper_forward(obs2, z2, slab, scalars, bb=128)
    jax.block_until_ready(out2)

    ref_out2, ref_enn2 = reference_forward(obs2, z2, params)
    assert out2.shape == (B2, 1)
    assert jnp.allclose(out2, ref_out2, atol=1e-4, rtol=1e-4), "multi-tile mismatch"
    assert jnp.allclose(enn2, ref_enn2, atol=1e-4, rtol=1e-4), "multi-tile enn mismatch"

    print("KERNEL_OK")
</pallas_src>

<mosaic_0001>
module attributes {stable_mosaic.version = 11 : i64} {
  func.func @enn_wrapper_kernel(%arg0: i32, %arg1: memref<8x32xf32, #tpu.memory_space<vmem>>, %arg2: memref<8x8xf32, #tpu.memory_space<vmem>>, %arg3: memref<136x34xf32, #tpu.memory_space<vmem>>, %arg4: memref<2xf32, #tpu.memory_space<smem>>, %arg5: memref<8x2xf32, #tpu.memory_space<vmem>>) attributes {dimension_semantics = [#tpu.dimension_semantics<parallel>], iteration_bounds = array<i64: 1>, scalar_prefetch = 0 : i64, scratch_operands = 0 : i64, tpu.core_type = #tpu.core_type<tc>, window_params = [{transform_indices = @transform_0, window_bounds = array<i64: 8, 32>}, {transform_indices = @transform_1, window_bounds = array<i64: 8, 8>}, {pipeline_mode = #tpu.pipeline_mode<synchronous>, transform_indices = @transform_2, window_bounds = array<i64: 136, 34>}, {transform_indices = @transform_3, window_bounds = array<i64: 2>}, {transform_indices = @transform_4, window_bounds = array<i64: 8, 2>}]} {
    %c0 = arith.constant 0 : index
    %c0_0 = arith.constant 0 : index
    %0 = vector.load %arg1[%c0, %c0_0] : memref<8x32xf32, #tpu.memory_space<vmem>>, vector<8x32xf32>
    %c0_1 = arith.constant 0 : index
    %c0_2 = arith.constant 0 : index
    %1 = vector.load %arg2[%c0_1, %c0_2] : memref<8x8xf32, #tpu.memory_space<vmem>>, vector<8x8xf32>
    %c0_3 = arith.constant 0 : index
    %c0_4 = arith.constant 0 : index
    %2 = vector.load %arg3[%c0_3, %c0_4] : memref<136x34xf32, #tpu.memory_space<vmem>>, vector<32x32xf32>
    %c32 = arith.constant 32 : index
    %c0_5 = arith.constant 0 : index
    %3 = vector.load %arg3[%c32, %c0_5] : memref<136x34xf32, #tpu.memory_space<vmem>>, vector<32x32xf32>
    %c64 = arith.constant 64 : index
    %c0_6 = arith.constant 0 : index
    %4 = vector.load %arg3[%c64, %c0_6] : memref<136x34xf32, #tpu.memory_space<vmem>>, vector<32x32xf32>
    %c96 = arith.constant 96 : index
    %c0_7 = arith.constant 0 : index
    %5 = vector.load %arg3[%c96, %c0_7] : memref<136x34xf32, #tpu.memory_space<vmem>>, vector<32x34xf32>
    %c128 = arith.constant 128 : index
    %c0_8 = arith.constant 0 : index
    %6 = vector.load %arg3[%c128, %c0_8] : memref<136x34xf32, #tpu.memory_space<vmem>>, vector<1x32xf32>
    %c129 = arith.constant 129 : index
    %c0_9 = arith.constant 0 : index
    %7 = vector.load %arg3[%c129, %c0_9] : memref<136x34xf32, #tpu.memory_space<vmem>>, vector<1x32xf32>
    %c130 = arith.constant 130 : index
    %c0_10 = arith.constant 0 : index
    %8 = vector.load %arg3[%c130, %c0_10] : memref<136x34xf32, #tpu.memory_space<vmem>>, vector<1x34xf32>
    %c131 = arith.constant 131 : index
    %c0_11 = arith.constant 0 : index
    %9 = vector.load %arg3[%c131, %c0_11] : memref<136x34xf32, #tpu.memory_space<vmem>>, vector<1x32xf32>
    %c132 = arith.constant 132 : index
    %c0_12 = arith.constant 0 : index
    %10 = vector.load %arg3[%c132, %c0_12] : memref<136x34xf32, #tpu.memory_space<vmem>>, vector<1x32xf32>
    %c133 = arith.constant 133 : index
    %c0_13 = arith.constant 0 : index
    %11 = vector.load %arg3[%c133, %c0_13] : memref<136x34xf32, #tpu.memory_space<vmem>>, vector<1x32xf32>
    %c0_14 = arith.constant 0 : index
    %12 = memref.load %arg4[%c0_14] : memref<2xf32, #tpu.memory_space<smem>>
    %c1 = arith.constant 1 : index
    %13 = memref.load %arg4[%c1] : memref<2xf32, #tpu.memory_space<smem>>
    %cst = arith.constant dense<0.000000e+00> : vector<8x32xf32>
    %14 = tpu.matmul %0, %2, %cst {dimension_numbers = #tpu.dot_dimension_numbers<[1], [0], [0], [1], [0, 0, 1, 1], [], []>} : vector<8x32xf32>, vector<32x32xf32>, vector<8x32xf32> -> vector<8x32xf32>
    %15 = vector.broadcast %6 : vector<1x32xf32> to vector<8x32xf32>
    %16 = arith.addf %14, %15 : vector<8x32xf32>
    %cst_15 = arith.constant 0.000000e+00 : f32
    %17 = vector.broadcast %cst_15 : f32 to vector<8x32xf32>
    %18 = arith.cmpf oge, %16, %17 : vector<8x32xf32>
    %cst_16 = arith.constant 0.00999999977 : f32
    %19 = vector.broadcast %cst_16 : f32 to vector<8x32xf32>
    %20 = arith.mulf %19, %16 : vector<8x32xf32>
    %21 = arith.select %18, %16, %20 : vector<8x32xi1>, vector<8x32xf32>
    %cst_17 = arith.constant dense<0.000000e+00> : vector<8x32xf32>
    %22 = tpu.matmul %21, %3, %cst_17 {dimension_numbers = #tpu.dot_dimension_numbers<[1], [0], [0], [1], [0, 0, 1, 1], [], []>} : vector<8x32xf32>, vector<32x32xf32>, vector<8x32xf32> -> vector<8x32xf32>
    %23 = vector.broadcast %7 : vector<1x32xf32> to vector<8x32xf32>
    %24 = arith.addf %22, %23 : vector<8x32xf32>
    %cst_18 = arith.constant 0.000000e+00 : f32
    %25 = vector.broadcast %cst_18 : f32 to vector<8x32xf32>
    %26 = arith.cmpf oge, %24, %25 : vector<8x32xf32>
    %cst_19 = arith.constant 0.00999999977 : f32
    %27 = vector.broadcast %cst_19 : f32 to vector<8x32xf32>
    %28 = arith.mulf %27, %24 : vector<8x32xf32>
    %29 = arith.select %26, %24, %28 : vector<8x32xi1>, vector<8x32xf32>
    %cst_20 = arith.constant dense<0.000000e+00> : vector<8x34xf32>
    %30 = tpu.matmul %29, %5, %cst_20 {dimension_numbers = #tpu.dot_dimension_numbers<[1], [0], [0], [1], [0, 0, 1, 1], [], []>} : vector<8x32xf32>, vector<32x34xf32>, vector<8x34xf32> -> vector<8x34xf32>
    %31 = vector.broadcast %8 : vector<1x34xf32> to vector<8x34xf32>
    %32 = arith.addf %30, %31 : vector<8x34xf32>
    %33 = vector.extract_strided_slice %32 {offsets = [0, 0], sizes = [8, 32], strides = [1, 1]} : vector<8x34xf32> to vector<8x32xf32>
    %34 = vector.extract_strided_slice %32 {offsets = [0, 32], sizes = [8, 1], strides = [1, 1]} : vector<8x34xf32> to vector<8x1xf32>
    %cst_21 = arith.constant 0.000000e+00 : f32
    %35 = vector.broadcast %cst_21 : f32 to vector<8x1xf32>
    %36 = arith.cmpf oge, %34, %35 : vector<8x1xf32>
    %cst_22 = arith.constant 0.00999999977 : f32
    %37 = vector.broadcast %cst_22 : f32 to vector<8x1xf32>
    %38 = arith.mulf %37, %34 : vector<8x1xf32>
    %39 = arith.select %36, %34, %38 : vector<8x1xi1>, vector<8x1xf32>
    %40 = vector.extract_strided_slice %32 {offsets = [0, 33], sizes = [8, 1], strides = [1, 1]} : vector<8x34xf32> to vector<8x1xf32>
    %41 = tpu.concatenate %33, %33, %33, %33, %33, %33, %33, %33 in 0 : vector<8x32xf32>, vector<8x32xf32>, vector<8x32xf32>, vector<8x32xf32>, vector<8x32xf32>, vector<8x32xf32>, vector<8x32xf32>, vector<8x32xf32> -> vector<64x32xf32>
    %42 = vector.extract_strided_slice %1 {offsets = [0, 0], sizes = [8, 1], strides = [1, 1]} : vector<8x8xf32> to vector<8x1xf32>
    %43 = vector.extract_strided_slice %1 {offsets = [0, 1], sizes = [8, 1], strides = [1, 1]} : vector<8x8xf32> to vector<8x1xf32>
    %44 = vector.extract_strided_slice %1 {offsets = [0, 2], sizes = [8, 1], strides = [1, 1]} : vector<8x8xf32> to vector<8x1xf32>
    %45 = vector.extract_strided_slice %1 {offsets = [0, 3], sizes = [8, 1], strides = [1, 1]} : vector<8x8xf32> to vector<8x1xf32>
    %46 = vector.extract_strided_slice %1 {offsets = [0, 4], sizes = [8, 1], strides = [1, 1]} : vector<8x8xf32> to vector<8x1xf32>
    %47 = vector.extract_strided_slice %1 {offsets = [0, 5], sizes = [8, 1], strides = [1, 1]} : vector<8x8xf32> to vector<8x1xf32>
    %48 = vector.extract_strided_slice %1 {offsets = [0, 6], sizes = [8, 1], strides = [1, 1]} : vector<8x8xf32> to vector<8x1xf32>
    %49 = vector.extract_strided_slice %1 {offsets = [0, 7], sizes = [8, 1], strides = [1, 1]} : vector<8x8xf32> to vector<8x1xf32>
    %50 = tpu.concatenate %42, %43, %44, %45, %46, %47, %48, %49 in 0 : vector<8x1xf32>, vector<8x1xf32>, vector<8x1xf32>, vector<8x1xf32>, vector<8x1xf32>, vector<8x1xf32>, vector<8x1xf32>, vector<8x1xf32> -> vector<64x1xf32>
    %51 = vector.broadcast %50 : vector<64x1xf32> to vector<64x32xf32>
    %52 = vector.broadcast %9 : vector<1x32xf32> to vector<64x32xf32>
    %53 = arith.mulf %51, %52 : vector<64x32xf32>
    %54 = arith.addf %41, %53 : vector<64x32xf32>
    %cst_23 = arith.constant 0.000000e+00 : f32
    %55 = vector.broadcast %cst_23 : f32 to vector<64x32xf32>
    %56 = arith.cmpf oge, %54, %55 : vector<64x32xf32>
    %cst_24 = arith.constant 0.00999999977 : f32
    %57 = vector.broadcast %cst_24 : f32 to vector<64x32xf32>
    %58 = arith.mulf %57, %54 : vector<64x32xf32>
    %59 = arith.select %56, %54, %58 : vector<64x32xi1>, vector<64x32xf32>
    %cst_25 = arith.constant dense<0.000000e+00> : vector<64x32xf32>
    %60 = tpu.matmul %59, %4, %cst_25 {dimension_numbers = #tpu.dot_dimension_numbers<[1], [0], [0], [1], [0, 0, 1, 1], [], []>} : vector<64x32xf32>, vector<32x32xf32>, vector<64x32xf32> -> vector<64x32xf32>
    %61 = vector.broadcast %10 : vector<1x32xf32> to vector<64x32xf32>
    %62 = arith.addf %60, %61 : vector<64x32xf32>
    %cst_26 = arith.constant 0.000000e+00 : f32
    %63 = vector.broadcast %cst_26 : f32 to vector<64x32xf32>
    %64 = arith.cmpf oge, %62, %63 : vector<64x32xf32>
    %cst_27 = arith.constant 0.00999999977 : f32
    %65 = vector.broadcast %cst_27 : f32 to vector<64x32xf32>
    %66 = arith.mulf %65, %62 : vector<64x32xf32>
    %67 = arith.select %64, %62, %66 : vector<64x32xi1>, vector<64x32xf32>
    %68 = vector.broadcast %11 : vector<1x32xf32> to vector<64x32xf32>
    %69 = arith.mulf %67, %68 : vector<64x32xf32>
    %cst_28 = arith.constant dense<0.000000e+00> : vector<64xf32>
    %70 = vector.multi_reduction <add>, %69, %cst_28 [1] : vector<64x32xf32> to vector<64xf32>
    %71 = vector.shape_cast %70 : vector<64xf32> to vector<64x1xf32>
    %72 = vector.broadcast %12 : f32 to vector<64x1xf32>
    %73 = arith.addf %71, %72 : vector<64x1xf32>
    %cst_29 = arith.constant 0.000000e+00 : f32
    %74 = vector.broadcast %cst_29 : f32 to vector<64x1xf32>
    %75 = arith.cmpf oge, %73, %74 : vector<64x1xf32>
    %cst_30 = arith.constant 0.00999999977 : f32
    %76 = vector.broadcast %cst_30 : f32 to vector<64x1xf32>
    %77 = arith.mulf %76, %73 : vector<64x1xf32>
    %78 = arith.select %75, %73, %77 : vector<64x1xi1>, vector<64x1xf32>
    %79 = arith.mulf %78, %50 : vector<64x1xf32>
    %80 = vector.extract_strided_slice %79 {offsets = [0, 0], sizes = [8, 1], strides = [1, 1]} : vector<64x1xf32> to vector<8x1xf32>
    %81 = vector.extract_strided_slice %79 {offsets = [8, 0], sizes = [8, 1], strides = [1, 1]} : vector<64x1xf32> to vector<8x1xf32>
    %82 = vector.extract_strided_slice %79 {offsets = [16, 0], sizes = [8, 1], strides = [1, 1]} : vector<64x1xf32> to vector<8x1xf32>
    %83 = vector.extract_strided_slice %79 {offsets = [24, 0], sizes = [8, 1], strides = [1, 1]} : vector<64x1xf32> to vector<8x1xf32>
    %84 = vector.extract_strided_slice %79 {offsets = [32, 0], sizes = [8, 1], strides = [1, 1]} : vector<64x1xf32> to vector<8x1xf32>
    %85 = vector.extract_strided_slice %79 {offsets = [40, 0], sizes = [8, 1], strides = [1, 1]} : vector<64x1xf32> to vector<8x1xf32>
    %86 = vector.extract_strided_slice %79 {offsets = [48, 0], sizes = [8, 1], strides = [1, 1]} : vector<64x1xf32> to vector<8x1xf32>
    %87 = vector.extract_strided_slice %79 {offsets = [56, 0], sizes = [8, 1], strides = [1, 1]} : vector<64x1xf32> to vector<8x1xf32>
    %88 = arith.addf %80, %81 : vector<8x1xf32>
    %89 = arith.addf %82, %83 : vector<8x1xf32>
    %90 = arith.addf %84, %85 : vector<8x1xf32>
    %91 = arith.addf %86, %87 : vector<8x1xf32>
    %92 = arith.addf %88, %89 : vector<8x1xf32>
    %93 = arith.addf %90, %91 : vector<8x1xf32>
    %94 = arith.addf %92, %93 : vector<8x1xf32>
    %cst_31 = arith.constant dense<0.000000e+00> : vector<8xf32>
    %95 = vector.multi_reduction <add>, %1, %cst_31 [1] : vector<8x8xf32> to vector<8xf32>
    %96 = vector.shape_cast %95 : vector<8xf32> to vector<8x1xf32>
    %97 = arith.mulf %1, %1 : vector<8x8xf32>
    %cst_32 = arith.constant dense<0.000000e+00> : vector<8xf32>
    %98 = vector.multi_reduction <add>, %97, %cst_32 [1] : vector<8x8xf32> to vector<8xf32>
    %99 = vector.shape_cast %98 : vector<8xf32> to vector<8x1xf32>
    %100 = vector.broadcast %13 : f32 to vector<8x1xf32>
    %101 = arith.mulf %100, %99 : vector<8x1xf32>
    %102 = arith.mulf %96, %40 : vector<8x1xf32>
    %103 = arith.addf %101, %102 : vector<8x1xf32>
    %104 = arith.addf %94, %103 : vector<8x1xf32>
    %105 = arith.addf %39, %104 : vector<8x1xf32>
    %106 = tpu.concatenate %105, %104 in 1 : vector<8x1xf32>, vector<8x1xf32> -> vector<8x2xf32>
    %c0_33 = arith.constant 0 : index
    %c0_34 = arith.constant 0 : index
    %107 = vector.load %arg5[%c0_33, %c0_34] : memref<8x2xf32, #tpu.memory_space<vmem>>, vector<8x2xf32>
    tpu.vector_store %arg5[%c0_33, %c0_34], %106 {strides = array<i32>} : memref<8x2xf32, #tpu.memory_space<vmem>>, vector<8x2xf32>,
    return
  }
  func.func @transform_0(%arg0: i32) -> (i32, i32) {
    %c0_i32 = arith.constant 0 : i32
    %c0_i32_0 = arith.constant 0 : i32
    return %arg0, %c0_i32 : i32, i32
  }
  func.func @transform_1(%arg0: i32) -> (i32, i32) {
    %c0_i32 = arith.constant 0 : i32
    %c0_i32_0 = arith.constant 0 : i32
    return %arg0, %c0_i32 : i32, i32
  }
  func.func @transform_2(%arg0: i32) -> (i32, i32) {
    %c0_i32 = arith.constant 0 : i32
    %c0_i32_0 = arith.constant 0 : i32
    %c0_i32_1 = arith.constant 0 : i32
    return %c0_i32, %c0_i32_0 : i32, i32
  }
  func.func @transform_3(%arg0: i32) -> i32 {
    %c0_i32 = arith.constant 0 : i32
    %c0_i32_0 = arith.constant 0 : i32
    return %c0_i32 : i32
  }
  func.func @transform_4(%arg0: i32) -> (i32, i32) {
    %c0_i32 = arith.constant 0 : i32
    %c0_i32_0 = arith.constant 0 : i32
    return %arg0, %c0_i32 : i32, i32
  }
}

</mosaic_0001>

<bundles_post_ra>
// kernel: enn_wrapper_forward.1
= control target key start
LH: loop header
LB: loop body
LE: loop exit
PB: predicated region body
PF: predicated region fallthrough
CT: control target
= control target key end

     0   :  { %9 = vsyncpa [#allocation3], 0  ;;  %s1028_s0 = inlined_call_operand.vmem [shape: f32[8,32], index: 0, kind: input, shape index: {}]   ;;  %s1029_s1 = inlined_call_operand.vmem [shape: f32[8,8], index: 1, kind: input, shape index: {}]   ;;  %s1030_s2 = inlined_call_operand.vmem [shape: f32[136,34], index: 2, kind: input, shape index: {}]   ;;  %s1031_s3 = inlined_call_operand.vmem [shape: f32[2], index: 3, kind: input, shape index: {}]   ;;  %s1032_s4 = inlined_call_operand.vmem [shape: f32[8,2], index: 4, kind: output, shape index: {}]  }
   0x1   :  { %s22_s17 = sshll.u32 %s1031_s3, 4  ;;  %s23_s17 = int_to_ptr.vmem [resolvable:$true] %s22_s17 }
   0x2   :  { %s816_s18 = scalar_lea.vmem %s23_s17, 16  ;;  %p821_p1 = scmp.lt.s32.totalorder %s23_s17, %s23_s17 }
   0x3   :  { %p817_p0 = scmp.ne.s32.totalorder %s23_s17, %s816_s18  ;;  %p822_p2 = scmp.lt.s32.totalorder %s816_s18, %s816_s18 }
   0x5   :  { %p823_p3 = por %p822_p2, %p821_p1 }
   0x7   :  { %p824_p4 = pnand %p823_p3, %p817_p0 }
   0x9   :  { %827 = shalt.err (!%p824_p4)
}
   0xa   :  { %s830_s19 = smov [#allocation2]  }
   0xb   :  { %25 = dma.vmem_to_smem %s23_s17, 16, %s830_s19, [#allocation3]  }
   0xc   :  { %828 = dma.done.wait [#allocation3], 16  }
   0xd   :  { %829 = vsyncadd [#allocation3], 4294967280 }
   0xe   :  { %29 = sfence }
   0xf   :  { %v32_v0 = vld [vmem:[%s1030_s2] sm:$0xff]  ;;  %v33_v1 = vld [vmem:[%s1030_s2 + $0x8] sm:$0xff]  ;;  %v34_v2 = vld [vmem:[%s1030_s2 + $0x10] sm:$0xff]  ;;  %v831_v3 = vmov 0.0|0.0   ;;  %vm832_vm0 = vmmov 0   ;;  %v833_v6 = vmov 0.0  }
  0x10   :  { %772 = vmatprep.subr.bf16.mxu0 %v831_v3  ;;  %v773_v4 = vpack.c.bf16 %v33_v1, %v32_v0  ;;  %v35_v5 = vld [vmem:[%s1030_s2 + $0x18] sm:$0xff]  ;;  %727 = vmatprep.mubr.msk.f32.mxu0 %vm832_vm0, %v833_v6  ;;  %v36_v8 = vld [vmem:[%s1030_s2 + $0x20] sm:$0xff]  ;;  %v37_v9 = vld [vmem:[%s1030_s2 + $0x28] sm:$0xff]  ;;  %vm60_vm1 = vcmask 261120   ;;  %s834_s12 = smov 127   ;;  %s835_s13 = smov 125  }
  0x11   :  { %v776_v7 = vpack.c.bf16 %v35_v5, %v34_v2  ;;  %v30_v10 = vld [vmem:[%s1028_s0] sm:$0xff]  ;;  %v779_v11 = vpack.c.bf16 %v37_v9, %v36_v8  ;;  %v38_v12 = vld [vmem:[%s1030_s2 + $0x30] sm:$0xff]  ;;  %v39_v13 = vld [vmem:[%s1030_s2 + $0x38] sm:$0xff]  ;;  %s836_s14 = smov 126   ;;  %s837_s15 = smov 124   ;;  %v841_v30 = vmov 0  }
  0x12   :  { %774 = vmatpush3.bf16.msra.mxu0 %v773_v4  ;;  %v782_v14 = vpack.c.bf16 %v39_v13, %v38_v12  ;;  %v907_v15 = vld [vmem:[%s1029_s1] sm:$0xff]  ;;  %s838_s16 = smov 123   ;;  %s839_s17 = smov 122   ;;  %v45_v19 = vld [vmem:[%s1030_s2 + $0x68] sm:$0xff]  ;;  %v46_v25 = vld [vmem:[%s1030_s2 + $0x70] sm:$0xff]  ;;  %814 = vset.pattern.permute.xlu1 %v841_v30  ;;  %vm636_vm3 = vcmask 64512  }
  0x13   :  { %775 = vmatprep.subr.bf16.mxu0 %v831_v3  ;;  %298 = vrot.lane.b32.xlu0 %v907_v15, %s834_s12  ;;  %s840_s1 = smov 121   ;;  %v675_v16 = vld [vmem:[%s1030_s2 + $0x80] ss:$0 sm:$0xff]  ;;  %v47_v26 = vld [vmem:[%s1030_s2 + $0x78] sm:$0xff]  ;;  %v637_v36 = vsel %vm636_vm3, %v907_v15, 0.0  ;;  %v640_v37 = vmul.f32 %v907_v15, %v907_v15  ;;  %v41_v46 = vld [vmem:[%s1030_s2 + $0x48] sm:$0xff] }
  0x14   :  { %304 = vrot.lane.b32.xlu1 %v907_v15, %s835_s13  ;;  %v44_v18 = vld [vmem:[%s1030_s2 + $0x60] sm:$0xff]  ;;  %v788_v27 = vpack.c.bf16 %v47_v26, %v46_v25  ;;  %815 = vset.pattern.permute.xlu0 %v841_v30  ;;  %v42_v48 = vld [vmem:[%s1030_s2 + $0x50] sm:$0xff]  ;;  %v43_v49 = vld [vmem:[%s1030_s2 + $0x58] sm:$0xff]  ;;  %s54_s18 = sld [smem:[#allocation2]]  ;;  %s843_s19 = smov 32  }
  0x15   :  { %v785_v23 = vpack.c.bf16 %v45_v19, %v44_v18  ;;  %v641_v38 = vsel %vm636_vm3, %v640_v37, 0.0  ;;  %v677_v39 = vld [vmem:[%s1030_s2 + $0x81] ss:$0 sm:$0xff]  ;;  %v794_v50 = vpack.c.bf16 %v43_v49, %v42_v48  ;;  %v681_v55 = vld [vmem:[%s1030_s2 + $0x83] ss:$0 sm:$0xff]  ;;  %s844_s20 = smov 96  }
  0x16   :  { %777 = vmatpush3.bf16.msra.mxu0 %v776_v7  ;;  %v40_v45 = vld [vmem:[%s1030_s2 + $0x40] sm:$0xff]  ;;  %s845_s21 = smov 1  }
  0x17   :  { %778 = vmatprep.subr.bf16.mxu0 %v831_v3  ;;  %301 = vrot.lane.b32.xlu0 %v907_v15, %s836_s14  ;;  %v790_v47 = vpack.c.bf16 %v41_v46, %v40_v45  ;;  %v679_v57 = vld [vmem:[%s1030_s2 + $0x82] ss:$0 sm:$0xff]  ;;  %v691_v46 = vld [vmem:[%s1030_s2 + $0x85] ss:$0 sm:$0xff] }
  0x18   :  { %307 = vrot.lane.b32.xlu1 %v907_v15, %s837_s15 }
  0x19   :  { %728 = vmatmul.mubr.msk.f32.vlgmr.msra.gmra.mrb[0].mxu0 %vm60_vm1, %v30_v10  ;;  %791 = vmatprep.subr.bf16.mxu1 %v790_v47 }
  0x1a   :  { %780 = vmatpush3.bf16.msra.mxu0 %v779_v11  ;;  %738 = vmatprep.mubr.msk.f32.mxu0 %vm832_vm0, %v833_v6 }
  0x1b   :  { %781 = vmatprep.subr.bf16.mxu0 %v831_v3  ;;  %310 = vrot.lane.b32.xlu0 %v907_v15, %s838_s16 }
  0x1c   :  { %313 = vrot.lane.b32.xlu1 %v907_v15, %s839_s17  ;;  %793 = vmatpush3.bf16.msra.mxu1 %v790_v47 }
  0x1d   :  { %795 = vmatprep.subr.bf16.mxu1 %v794_v50 }
  0x1e   :  { %783 = vmatpush3.bf16.msra.mxu0 %v782_v14 }
  0x1f   :  { %784 = vmatprep.subr.bf16.mxu0 %v831_v3  ;;  %316 = vrot.lane.b32.xlu0 %v907_v15, %s840_s1  ;;  %s842_s1 = smov 95  }
  0x20   :  { %320 = vperm.xlu1 %814, %v907_v15   ;;  %797 = vmatpush3.bf16.msra.mxu1 %v794_v50 }
  0x85   :  { %v933_v28 = vpop.permute.xlu0 %298 }
  0x86   :  { %v935_v29 = vpop.permute.xlu1 %304  ;;  %324 = vperm.xlu0 %815, %v933_v28  }
  0x89   :  { %v939_v31 = vpop.permute.xlu0 %301 }
  0x8a   :  { %v941_v32 = vpop.permute.xlu1 %307  ;;  %328 = vperm.xlu1 %814, %v939_v31  }
  0x8b   :  { %336 = vperm.xlu0 %815, %v941_v32  }
  0x8d   :  { %v947_v34 = vpop.permute.xlu0 %310 }
  0x8e   :  { %v945_v33 = vpop.permute.xlu1 %313  ;;  %332 = vperm.xlu1 %814, %v935_v29  }
  0x8f   :  { %344 = vperm.xlu0 %815, %v945_v33  }
  0x91   :  { %v952_v35 = vpop.permute.xlu0 %316 }
  0x92   :  { %340 = vperm.xlu1 %814, %v947_v34  }
  0x96   :  { %348 = vperm.xlu1 %814, %v952_v35  }
  0x9f   :  { %v321_v51 = vpop.permute.xlu1 %320 }
  0xa0   :  { %v355_v58 = vmul.f32 %v681_v55, %v321_v51 }
  0xae   :  { %638 = vadd.xlane.f32.xlu0 %v637_v36 }
  0xba   :  { %642 = vadd.xlane.f32.xlu1 %v641_v38 }
  0xec   :  { %v130_v17 = vpop.f32.mrb[0].mxu0 }
  0xed   :  { %v131_v20 = vadd.f32 %v675_v16, %v130_v17  ;;  %v729_v21 = vpop.f32.mrb[1].mxu0 }
  0xef   :  { %vm134_vm2 = vcmp.ge.f32.partialorder %v131_v20, 0.0  ;;  %v135_v22 = vmul.f32 0.01, %v131_v20 }
  0xf1   :  { %v136_v24 = vsel %vm134_vm2, %v131_v20, %v135_v22 }
  0xf2   :  { %739 = vmatmul.mubr.msk.f32.vlgmr.msra.gmra.mrb[2].mxu0 %vm60_vm1, %v136_v24 }
  0xf3   :  { %786 = vmatpush3.bf16.msra.mxu0 %v785_v23  ;;  %749 = vmatprep.mubr.msk.f32.mxu0 %vm832_vm0, %v833_v6 }
  0xf4   :  { %787 = vmatprep.subr.bf16.mxu0 %v831_v3 }
  0xf7   :  { %789 = vmatpush3.bf16.msra.mxu0 %v788_v27 }
 0x105   :  { %v325_v53 = vpop.permute.xlu0 %324 }
 0x106   :  { %v356_v60 = vmul.f32 %v681_v55, %v325_v53 }
 0x109   :  { %v329_v52 = vpop.permute.xlu1 %328 }
 0x10a   :  { %v337_v56 = vpop.permute.xlu0 %336  ;;  %v357_v59 = vmul.f32 %v681_v55, %v329_v52 }
 0x10b   :  { %v359_v0 = vmul.f32 %v681_v55, %v337_v56 }
 0x10d   :  { %v333_v54 = vpop.permute.xlu1 %332 }
 0x10e   :  { %v358_v61 = vmul.f32 %v681_v55, %v333_v54  ;;  %v345_v3 = vpop.permute.xlu0 %344 }
 0x10f   :  { %v361_v8 = vmul.f32 %v681_v55, %v345_v3 }
 0x111   :  { %v341_v63 = vpop.permute.xlu1 %340 }
 0x112   :  { %v360_v7 = vmul.f32 %v681_v55, %v341_v63 }
 0x115   :  { %v349_v14 = vpop.permute.xlu1 %348 }
 0x116   :  { %v362_v17 = vmul.f32 %v681_v55, %v349_v14 }
 0x1c5   :  { %v210_v40 = vpop.f32.mrb[2].mxu0 }
 0x1c6   :  { %v211_v41 = vadd.f32 %v677_v39, %v210_v40  ;;  %v740_v42 = vpop.f32.mrb[3].mxu0  ;;  %v682_v40 = vld [vmem:[%s1030_s2 + $0x84] ss:$0 sm:$0xff]  ;;  %s674_s2 = sld [smem:[#allocation2 + $0x1]] }
 0x1c8   :  { %vm214_vm4 = vcmp.ge.f32.partialorder %v211_v41, 0.0  ;;  %v215_v43 = vmul.f32 0.01, %v211_v41 }
 0x1ca   :  { %v216_v44 = vsel %vm214_vm4, %v211_v41, %v215_v43 }
 0x1cb   :  { %750 = vmatmul.mubr.msk.f32.vlgmr.msra.gmra.mrb[4].mxu0 %vm60_vm1, %v216_v44 }
 0x29e   :  { %v290_v62 = vpop.f32.mrb[4].mxu0 }
 0x29f   :  { %v980_v1 = vadd.f32 %v679_v57, %v290_v62  ;;  %v751_v2 = vpop.f32.mrb[5].mxu0 }
 0x2a1   :  { %v363_v4 = vadd.f32 %v355_v58, %v980_v1  ;;  %v364_v5 = vadd.f32 %v356_v60, %v980_v1  ;;  %v365_v6 = vadd.f32 %v357_v59, %v980_v1  ;;  %v366_v9 = vadd.f32 %v358_v61, %v980_v1 }
 0x2a2   :  { %v367_v11 = vadd.f32 %v359_v0, %v980_v1  ;;  %v368_v20 = vadd.f32 %v360_v7, %v980_v1  ;;  %v369_v23 = vadd.f32 %v361_v8, %v980_v1  ;;  %v370_v26 = vadd.f32 %v362_v17, %v980_v1 }
 0x2a3   :  { %vm371_vm5 = vcmp.ge.f32.partialorder %v363_v4, 0.0  ;;  %v379_v10 = vmul.f32 0.01, %v363_v4  ;;  %vm372_vm6 = vcmp.ge.f32.partialorder %v364_v5, 0.0  ;;  %v380_v12 = vmul.f32 0.01, %v364_v5 }
 0x2a4   :  { %vm373_vm7 = vcmp.ge.f32.partialorder %v365_v6, 0.0  ;;  %v381_v13 = vmul.f32 0.01, %v365_v6  ;;  %v382_v19 = vmul.f32 0.01, %v366_v9  ;;  %vm374_vm8 = vcmp.ge.f32.partialorder %v366_v9, 0.0 }
 0x2a5   :  { %v387_v16 = vsel %vm371_vm5, %v363_v4, %v379_v10  ;;  %v388_v18 = vsel %vm372_vm6, %v364_v5, %v380_v12  ;;  %v383_v22 = vmul.f32 0.01, %v367_v11  ;;  %vm375_vm9 = vcmp.ge.f32.partialorder %v367_v11, 0.0 }
 0x2a6   :  { %760 = vmatprep.mubr.msk.f32.mxu1 %vm60_vm1, %v387_v16  ;;  %v389_v21 = vsel %vm373_vm7, %v365_v6, %v381_v13  ;;  %v390_v24 = vsel %vm374_vm8, %v366_v9, %v382_v19  ;;  %v384_v25 = vmul.f32 0.01, %v368_v20  ;;  %vm376_vm10 = vcmp.ge.f32.partialorder %v368_v20, 0.0 }
 0x2a7   :  { %761 = vmatmul.mubr.msk.f32.vlgmr.msra.gmra.mrb[0].mxu1 %vm60_vm1, %v388_v18  ;;  %v391_v27 = vsel %vm375_vm9, %v367_v11, %v383_v22  ;;  %v385_v30 = vmul.f32 0.01, %v369_v23  ;;  %vm377_vm11 = vcmp.ge.f32.partialorder %v369_v23, 0.0  ;;  %v386_v37 = vmul.f32 0.01, %v370_v26 }
 0x2a8   :  { %763 = vmatprep.mubr.msk.f32.mxu1 %vm60_vm1, %v389_v21  ;;  %v392_v36 = vsel %vm376_vm10, %v368_v20, %v384_v25  ;;  %vm378_vm12 = vcmp.ge.f32.partialorder %v370_v26, 0.0 }
 0x2a9   :  { %v393_v38 = vsel %vm377_vm11, %v369_v23, %v385_v30  ;;  %v394_v39 = vsel %vm378_vm12, %v370_v26, %v386_v37  ;;  %v644_v30 = vstv %s674_s2  ;;  %v639_v37 = vpop.xlane.xlu0 %638 }
 0x2ab   :  { %764 = vmatmul.mubr.msk.f32.gmra.mrb[2].mxu1 %vm60_vm1, %v390_v24 }
 0x2ac   :  { %766 = vmatprep.mubr.msk.f32.mxu1 %vm60_vm1, %v391_v27 }
 0x2af   :  { %767 = vmatmul.mubr.msk.f32.gmra.mrb[4].mxu1 %vm60_vm1, %v392_v36  ;;  %v643_v36 = vpop.xlane.xlu1 %642 }
 0x2b0   :  { %769 = vmatprep.mubr.msk.f32.mxu1 %vm60_vm1, %v393_v38  ;;  %v645_v38 = vmul.f32 %v644_v30, %v643_v36 }
 0x2b3   :  { %770 = vmatmul.mubr.msk.f32.gmra.mrb[6].mxu1 %vm60_vm1, %v394_v39  ;;  %v646_v39 = vmul.f32 %v639_v37, %v980_v1 }
 0x37a   :  { %v762_v41 = vpop.f32.mrb[0].mxu1 }
 0x37b   :  { %v495_v42 = vadd.f32 %v762_v41, %v682_v40  ;;  %v489_v43 = vpop.f32.mrb[1].mxu1 }
 0x37c   :  { %v490_v44 = vadd.f32 %v682_v40, %v489_v43 }
 0x37d   :  { %vm529_vm13 = vcmp.ge.f32.partialorder %v495_v42, 0.0  ;;  %v537_v45 = vmul.f32 0.01, %v495_v42 }
 0x37e   :  { %vm528_vm14 = vcmp.ge.f32.partialorder %v490_v44, 0.0  ;;  %v536_v47 = vmul.f32 0.01, %v490_v44  ;;  %v765_v48 = vpop.f32.mrb[2].mxu1 }
 0x37f   :  { %v505_v49 = vadd.f32 %v765_v48, %v682_v40  ;;  %v499_v50 = vpop.f32.mrb[3].mxu1  ;;  %v545_v51 = vsel %vm529_vm13, %v495_v42, %v537_v45  ;;  %vm294_vm13 = vcmp.ge.f32.partialorder %v980_v1, 0.0 }
 0x380   :  { %v500_v52 = vadd.f32 %v682_v40, %v499_v50  ;;  %v557_v53 = vmul.f32 %v691_v46, %v545_v51  ;;  %v544_v54 = vsel %vm528_vm14, %v490_v44, %v536_v47  ;;  %v588_v44 = vstv %s54_s18 }
 0x381   :  { %vm531_vm15 = vcmp.ge.f32.partialorder %v505_v49, 0.0  ;;  %v539_v55 = vmul.f32 0.01, %v505_v49  ;;  %v556_v59 = vmul.f32 %v691_v46, %v544_v54  ;;  %vm665_vm14 = vcmask 7168  }
 0x382   :  { %vm530_vm0 = vcmp.ge.f32.partialorder %v500_v52, 0.0  ;;  %v538_v56 = vmul.f32 0.01, %v500_v52  ;;  %v768_v57 = vpop.f32.mrb[4].mxu1  ;;  %v567_v58 = vsel %vm60_vm1, %v557_v53, 0.0 }
 0x383   :  { %v515_v60 = vadd.f32 %v768_v57, %v682_v40  ;;  %568 = vadd.xlane.f32.xlu0 %v567_v58  ;;  %v509_v61 = vpop.f32.mrb[5].mxu1  ;;  %v547_v62 = vsel %vm531_vm15, %v505_v49, %v539_v55  ;;  %v564_v6 = vsel %vm60_vm1, %v556_v59, 0.0  ;;  %vm667_vm15 = vcmask 15360  }
 0x384   :  { %v510_v63 = vadd.f32 %v682_v40, %v509_v61  ;;  %v546_v0 = vsel %vm530_vm0, %v500_v52, %v538_v56  ;;  %v559_v7 = vmul.f32 %v691_v46, %v547_v62 }
 0x385   :  { %vm533_vm2 = vcmp.ge.f32.partialorder %v515_v60, 0.0  ;;  %v541_v2 = vmul.f32 0.01, %v515_v60  ;;  %v558_v3 = vmul.f32 %v691_v46, %v546_v0 }
 0x386   :  { %vm532_vm3 = vcmp.ge.f32.partialorder %v510_v63, 0.0  ;;  %v540_v4 = vmul.f32 0.01, %v510_v63  ;;  %v771_v5 = vpop.f32.mrb[6].mxu1  ;;  %v573_v18 = vsel %vm60_vm1, %v559_v7, 0.0 }
 0x387   :  { %v525_v8 = vadd.f32 %v771_v5, %v682_v40  ;;  %v519_v9 = vpop.f32.mrb[7].mxu1  ;;  %565 = vadd.xlane.f32.xlu0 %v564_v6  ;;  %v570_v10 = vsel %vm60_vm1, %v558_v3, 0.0  ;;  %v549_v11 = vsel %vm533_vm2, %v515_v60, %v541_v2 }
 0x388   :  { %v520_v12 = vadd.f32 %v682_v40, %v519_v9  ;;  %571 = vadd.xlane.f32.xlu1 %v570_v10  ;;  %v548_v13 = vsel %vm532_vm3, %v510_v63, %v540_v4  ;;  %v561_v19 = vmul.f32 %v691_v46, %v549_v11  ;;  %v647_v40 = vadd.f32 %v646_v39, %v645_v38 }
 0x389   :  { %vm535_vm4 = vcmp.ge.f32.partialorder %v525_v8, 0.0  ;;  %v543_v14 = vmul.f32 0.01, %v525_v8  ;;  %v560_v16 = vmul.f32 %v691_v46, %v548_v13 }
 0x38a   :  { %vm534_vm5 = vcmp.ge.f32.partialorder %v520_v12, 0.0  ;;  %v542_v17 = vmul.f32 0.01, %v520_v12  ;;  %v579_v24 = vsel %vm60_vm1, %v561_v19, 0.0 }
 0x38b   :  { %574 = vadd.xlane.f32.xlu0 %v573_v18  ;;  %v576_v20 = vsel %vm60_vm1, %v560_v16, 0.0  ;;  %v551_v21 = vsel %vm535_vm4, %v525_v8, %v543_v14 }
 0x38c   :  { %577 = vadd.xlane.f32.xlu1 %v576_v20  ;;  %v550_v22 = vsel %vm534_vm5, %v520_v12, %v542_v17  ;;  %v563_v25 = vmul.f32 %v691_v46, %v551_v21 }
 0x38d   :  { %v562_v23 = vmul.f32 %v691_v46, %v550_v22 }
 0x38e   :  { %v585_v27 = vsel %vm60_vm1, %v563_v25, 0.0 }
 0x38f   :  { %580 = vadd.xlane.f32.xlu0 %v579_v24  ;;  %v582_v26 = vsel %vm60_vm1, %v562_v23, 0.0 }
 0x390   :  { %583 = vadd.xlane.f32.xlu1 %v582_v26 }
 0x393   :  { %586 = vadd.xlane.f32.xlu0 %v585_v27 }
 0x3a1   :  { %649 = vrot.lane.b32.xlu1 %v647_v40, %s842_s1 }
 0x410   :  { %v569_v41 = vpop.xlane.xlu0 %568 }
 0x411   :  { %v590_v46 = vadd.f32 %v588_v44, %v569_v41 }
 0x413   :  { %vm598_vm6 = vcmp.ge.f32.partialorder %v590_v46, 0.0  ;;  %v606_v58 = vmul.f32 0.01, %v590_v46 }
 0x414   :  { %v566_v42 = vpop.xlane.xlu0 %565 }
 0x415   :  { %v572_v43 = vpop.xlane.xlu1 %571  ;;  %v589_v47 = vadd.f32 %v588_v44, %v566_v42  ;;  %v614_v6 = vsel %vm598_vm6, %v590_v46, %v606_v58 }
 0x416   :  { %v591_v48 = vadd.f32 %v588_v44, %v572_v43  ;;  %v622_v14 = vmul.f32 %v614_v6, %v933_v28  ;;  %v295_v28 = vmul.f32 0.01, %v980_v1 }
 0x417   :  { %v605_v54 = vmul.f32 0.01, %v589_v47  ;;  %vm597_vm7 = vcmp.ge.f32.partialorder %v589_v47, 0.0 }
 0x418   :  { %v575_v45 = vpop.xlane.xlu0 %574  ;;  %v607_v55 = vmul.f32 0.01, %v591_v48  ;;  %vm599_vm8 = vcmp.ge.f32.partialorder %v591_v48, 0.0 }
 0x419   :  { %v592_v49 = vadd.f32 %v588_v44, %v575_v45  ;;  %v578_v50 = vpop.xlane.xlu1 %577  ;;  %v613_v2 = vsel %vm597_vm7, %v589_v47, %v605_v54 }
 0x41a   :  { %v593_v52 = vadd.f32 %v588_v44, %v578_v50  ;;  %v615_v3 = vsel %vm599_vm8, %v591_v48, %v607_v55  ;;  %v621_v11 = vmul.f32 %v613_v2, %v907_v15 }
 0x41b   :  { %v608_v51 = vmul.f32 0.01, %v592_v49  ;;  %vm600_vm1 = vcmp.ge.f32.partialorder %v592_v49, 0.0  ;;  %v623_v12 = vmul.f32 %v615_v3, %v939_v31 }
 0x41c   :  { %v581_v53 = vpop.xlane.xlu0 %580  ;;  %v609_v61 = vmul.f32 0.01, %v593_v52  ;;  %vm601_vm10 = vcmp.ge.f32.partialorder %v593_v52, 0.0  ;;  %v629_v20 = vadd.f32 %v622_v14, %v621_v11 }
 0x41d   :  { %v594_v56 = vadd.f32 %v588_v44, %v581_v53  ;;  %v584_v57 = vpop.xlane.xlu1 %583  ;;  %v616_v60 = vsel %vm600_vm1, %v592_v49, %v608_v51 }
 0x41e   :  { %v595_v59 = vadd.f32 %v588_v44, %v584_v57  ;;  %v624_v7 = vmul.f32 %v616_v60, %v935_v29  ;;  %v617_v8 = vsel %vm601_vm10, %v593_v52, %v609_v61 }
 0x41f   :  { %vm602_vm9 = vcmp.ge.f32.partialorder %v594_v56, 0.0  ;;  %v610_v62 = vmul.f32 0.01, %v594_v56  ;;  %v625_v17 = vmul.f32 %v617_v8, %v941_v32 }
 0x420   :  { %vm603_vm11 = vcmp.ge.f32.partialorder %v595_v59, 0.0  ;;  %v611_v63 = vmul.f32 0.01, %v595_v59  ;;  %v587_v0 = vpop.xlane.xlu0 %586  ;;  %v630_v29 = vadd.f32 %v624_v7, %v623_v12 }
 0x421   :  { %v618_v4 = vsel %vm602_vm9, %v594_v56, %v610_v62  ;;  %v596_v5 = vadd.f32 %v588_v44, %v587_v0  ;;  %v650_v25 = vpop.permute.xlu1 %649 }
 0x422   :  { %v619_v9 = vsel %vm603_vm11, %v595_v59, %v611_v63  ;;  %v626_v13 = vmul.f32 %v618_v4, %v947_v34  ;;  %v633_v23 = vadd.f32 %v630_v29, %v629_v20 }
 0x423   :  { %vm604_vm12 = vcmp.ge.f32.partialorder %v596_v5, 0.0  ;;  %v612_v10 = vmul.f32 0.01, %v596_v5  ;;  %v627_v18 = vmul.f32 %v619_v9, %v945_v33  ;;  %v296_v33 = vsel %vm294_vm13, %v980_v1, %v295_v28 }
 0x424   :  { %v631_v21 = vadd.f32 %v626_v13, %v625_v17 }
 0x425   :  { %v620_v16 = vsel %vm604_vm12, %v596_v5, %v612_v10 }
 0x426   :  { %v628_v19 = vmul.f32 %v620_v16, %v952_v35 }
 0x428   :  { %v632_v22 = vadd.f32 %v628_v19, %v627_v18 }
 0x42a   :  { %v634_v24 = vadd.f32 %v632_v22, %v631_v21 }
 0x42c   :  { %v635_v15 = vadd.f32 %v634_v24, %v633_v23 }
 0x42e   :  { %v652_v31 = vadd.f32 %v650_v25, %v635_v15 }
 0x430   :  { %654 = vrot.lane.b32.xlu0 %v652_v31, %s843_s19 }
 0x4a2   :  { %v655_v32 = vpop.permute.xlu0 %654 }
 0x4a3   :  { %v657_v34 = vadd.f32 %v655_v32, %v296_v33 }
 0x4a5   :  { %659 = vrot.lane.b32.xlu1 %v657_v34, %s844_s20 }
 0x4a9   :  { %662 = vrot.lane.b32.xlu1 %v652_v31, %s845_s21 }
 0x517   :  { %v660_v35 = vpop.permute.xlu1 %659 }
 0x51b   :  { %v663_v26 = vpop.permute.xlu1 %662 }
 0x51c   :  { %v666_v27 = vsel %vm665_vm14, %v660_v35, %v663_v26 }
 0x51d   :  { %668 = vst.msk [vmem:[%s1032_s4] sm:$0xff] %vm667_vm15, %v666_v27 }
 0x51e   :  { %673 = vsyncpa [#allocation3], 1 }

</bundles_post_ra>
